<compile_context>
chip_gen: v7x
topology: tpu7x:2x2x1
jax: 0.10.0
libtpu: 0.0.40
codegen_flags: <defaults>
</compile_context>

<pallas_src>
import numpy as np
import jax
import jax.numpy as jnp
from jax.experimental import pallas as pl
from jax.experimental.pallas import tpu as pltpu


_LANE = 128
_TR_MAX = 512       # 512 rows x 128 lanes = 65536 pixels per tile.
_SMALL_ROWS = 512   # if N * Rr <= this, run the whole problem in one step.


def _mix_kernel(x_ref, w_ref, o_ref):
    """1x1-conv channel mix (no bias) on dense pixel slabs.

    x_ref: (BN, Cin, TR, 128)  f32 VMEM  -- full (sublane, lane) pixel planes
    w_ref: (Cout, Cin)         f32 SMEM  -- scalar weights
    o_ref: (BN, Cout, TR, 128) f32 VMEM
    """
    bn, cin = x_ref.shape[0], x_ref.shape[1]
    cout = o_ref.shape[1]
    for b in range(bn):                    # static unroll (bn small)
        for co in range(cout):             # static unroll (Cout <= 4)
            acc = x_ref[b, 0, :, :] * w_ref[co, 0]
            for ci in range(1, cin):       # static unroll (Cin <= 10)
                acc = acc + x_ref[b, ci, :, :] * w_ref[co, ci]
            o_ref[b, co, :, :] = acc.astype(o_ref.dtype)   # direct dense store


@jax.jit
def conv1x1_pad1(x_nchw, weight, bias):
    """Conv2d(kernel_size=1, stride=1, padding=1), PyTorch NCHW semantics.

    x_nchw: (N, Cin, H, W) f32
    weight: (Cout, Cin, 1, 1) f32
    bias:   (Cout,) f32
    returns: (N, Cout, H+2, W+2) f32
    """
    n, cin, h, w = x_nchw.shape
    cout = weight.shape[0]
    p = h * w
    rr = pl.cdiv(p, _LANE)          # rows of 128 pixels
    pr = rr * _LANE

    # Flat, lane-aligned pixel view of the raw (unpadded) input.
    x_flat = x_nchw.reshape(n, cin, p)
    if pr != p:
        # <=127 zero pixels per (n, ci): keeps all blocks lane-aligned so
        # stores stay dense; the tail is sliced off the output again below.
        x_flat = jnp.pad(x_flat, ((0, 0), (0, 0), (0, pr - p)))
    x4 = x_flat.reshape(n, cin, rr, _LANE)

    w2d = weight.reshape(cout, cin).astype(jnp.float32)

    # Tiling: one grid step for small problems; otherwise (batch, row-tiles)
    # so Pallas double-buffers HBM<->VMEM and megacore (v7x) sees >= 2 steps.
    if n * rr <= _SMALL_ROWS:
        bn, tr = n, rr                          # whole problem in one block
    else:
        bn, tr = 1, (rr if rr <= _TR_MAX else _TR_MAX)
    grid = (n // bn, pl.cdiv(rr, tr))

    y4 = pl.pallas_call(
        _mix_kernel,
        out_shape=jax.ShapeDtypeStruct((n, cout, rr, _LANE), jnp.float32),
        grid=grid,
        in_specs=[
            pl.BlockSpec((bn, cin, tr, _LANE), lambda i, t: (i, 0, t, 0)),
            pl.BlockSpec(memory_space=pltpu.MemorySpace.SMEM),
        ],
        out_specs=pl.BlockSpec((bn, cout, tr, _LANE), lambda i, t: (i, 0, t, 0)),
        compiler_params=pltpu.CompilerParams(
            dimension_semantics=("parallel", "parallel")),
        cost_estimate=pl.CostEstimate(
            flops=2 * n * p * cin * cout,
            transcendentals=0,
            bytes_accessed=4 * (n * pr * (cin + cout) + cout * cin)),
    )(x4, w2d)

    # Assemble the padded output: 1-px border is pure bias, interior gets the
    # bias added.  Slice + pad + broadcast-add fuse into a single XLA pass
    # over the kernel output (no pre-padded input copy in HBM).
    y_int = y4.reshape(n, cout, pr)[:, :, :p].reshape(n, cout, h, w)
    out = jnp.pad(y_int, ((0, 0), (0, 0), (1, 1), (1, 1)))
    return out + bias.reshape(1, cout, 1, 1).astype(jnp.float32)


def conv1x1_pad1_ref(x, weight, bias):
    """Plain-JAX reference (validation only)."""
    y = jax.lax.conv_general_dilated(
        x, weight, window_strides=(1, 1), padding=((1, 1), (1, 1)),
        dimension_numbers=("NCHW", "OIHW", "NCHW"))
    return y + bias.reshape(1, -1, 1, 1)


def make_conv_params(key, cout, cin):
    # Deterministic PyTorch-like init (uniform in +/- 1/sqrt(fan_in)).
    kw, kb = jax.random.split(key)
    bound = 1.0 / (cin ** 0.5)
    wgt = jax.random.uniform(kw, (cout, cin, 1, 1), jnp.float32, -bound, bound)
    b = jax.random.uniform(kb, (cout,), jnp.float32, -bound, bound)
    return wgt, b


def my_module_forward(x1, params, rng_key, padding5=True, x2=True, x3=True,
                      padding4=True, padding2=True, padding3=None):
    # v1 = self.conv1(x1)
    v1 = conv1x1_pad1(x1, *params["conv1"])

    # if x2 == True: x2 = torch.randn(x1.shape)
    if x2 is True:
        x2 = jax.random.normal(rng_key, x1.shape, jnp.float32)

    # TODO(synk): the original forward next calls self.conv2(x2), but conv2
    # expects 1 input channel while x2 has 4 channels, so PyTorch raises a
    # RuntimeError here.  Everything downstream (v1+v2 with 2 vs 3 channels,
    # conv4 on a 4-channel v4, conv5 on a mismatched cat, and the use of the
    # undefined `v8`) is likewise invalid, so the faithful forward ends at v1.
    return v1


if __name__ == "__main__":
    key = jax.random.PRNGKey(0)
    k_params, k_rand, k_x = jax.random.split(key, 3)

    # Parameter shapes from MyModule.__init__ (all kernel_size=1, padding=1).
    pkeys = jax.random.split(k_params, 5)
    params = {
        "conv1": make_conv_params(pkeys[0], 2, 4),
        "conv2": make_conv_params(pkeys[1], 3, 1),
        "conv3": make_conv_params(pkeys[2], 4, 2),
        "conv4": make_conv_params(pkeys[3], 4, 3),
        "conv5": make_conv_params(pkeys[4], 4, 10),
    }

    # Input shape from the original spec: x1 = torch.randn(4, 4, 32, 32).
    x1 = jax.random.normal(k_x, (4, 4, 32, 32), jnp.float32)

    # Faithful forward (up to the original module's first failing op).
    v1 = my_module_forward(x1, params, k_rand)
    v1 = jax.block_until_ready(v1)
    ref1 = conv1x1_pad1_ref(x1, *params["conv1"])
    assert v1.shape == (4, 2, 34, 34)
    assert np.allclose(np.asarray(v1), np.asarray(ref1), atol=1e-5, rtol=1e-5)

    # All five conv configurations (small single-step path), vs plain JAX.
    ekeys = jax.random.split(k_rand, 5)
    for ek, name in zip(ekeys, ["conv1", "conv2", "conv3", "conv4", "conv5"]):
        wgt, b = params[name]
        cin = wgt.shape[1]
        xin = jax.random.normal(ek, (2, cin, 16, 16), jnp.float32)
        got = jax.block_until_ready(conv1x1_pad1(xin, wgt, b))
        want = conv1x1_pad1_ref(xin, wgt, b)
        assert np.allclose(np.asarray(got), np.asarray(want), atol=1e-5, rtol=1e-5)

    k_big1, k_big2 = jax.random.split(k_rand)

    # Large path: multi row-tile grid with a masked lane-aligned tail
    # (P = 262*262 = 68644 -> Rr = 537 > 512 -> 2 row tiles).
    wgt, b = params["conv1"]                       # Cin=4, Cout=2
    x_big = jax.random.normal(k_big1, (1, 4, 262, 262), jnp.float32)
    got = jax.block_until_ready(conv1x1_pad1(x_big, wgt, b))
    want = conv1x1_pad1_ref(x_big, wgt, b)
    assert np.allclose(np.asarray(got), np.asarray(want), atol=1e-5, rtol=1e-5)

    # Large path: batch-tiled grid, P % 128 != 0 (tail pad + output slice),
    # full-extent row block that is not a multiple of 8.
    wgt, b = params["conv3"]                       # Cin=2, Cout=4
    x_big = jax.random.normal(k_big2, (4, 2, 136, 136), jnp.float32)
    got = jax.block_until_ready(conv1x1_pad1(x_big, wgt, b))
    want = conv1x1_pad1_ref(x_big, wgt, b)
    assert np.allclose(np.asarray(got), np.asarray(want), atol=1e-5, rtol=1e-5)

    print("KERNEL_OK")
</pallas_src>

<mosaic_0001>
module attributes {stable_mosaic.version = 11 : i64} {
  func.func @_mix_kernel(%arg0: i32, %arg1: i32, %arg2: memref<4x4x8x128xf32, #tpu.memory_space<vmem>>, %arg3: memref<2x4xf32, #tpu.memory_space<smem>>, %arg4: memref<4x2x8x128xf32, #tpu.memory_space<vmem>>) attributes {dimension_semantics = [#tpu.dimension_semantics<parallel>, #tpu.dimension_semantics<parallel>], iteration_bounds = array<i64: 1, 1>, scalar_prefetch = 0 : i64, scratch_operands = 0 : i64, tpu.core_type = #tpu.core_type<tc>, window_params = [{transform_indices = @transform_0, window_bounds = array<i64: 4, 4, 8, 128>}, {transform_indices = @transform_1, window_bounds = array<i64: 2, 4>}, {transform_indices = @transform_2, window_bounds = array<i64: 4, 2, 8, 128>}]} {
    %c0 = arith.constant 0 : index
    %c0_0 = arith.constant 0 : index
    %c0_1 = arith.constant 0 : index
    %c0_2 = arith.constant 0 : index
    %0 = vector.load %arg2[%c0, %c0_0, %c0_1, %c0_2] : memref<4x4x8x128xf32, #tpu.memory_space<vmem>>, vector<1x1x8x128xf32>
    %1 = vector.shape_cast %0 : vector<1x1x8x128xf32> to vector<8x128xf32>
    %c0_3 = arith.constant 0 : index
    %c0_4 = arith.constant 0 : index
    %2 = memref.load %arg3[%c0_3, %c0_4] : memref<2x4xf32, #tpu.memory_space<smem>>
    %3 = vector.broadcast %2 : f32 to vector<8x128xf32>
    %4 = arith.mulf %1, %3 : vector<8x128xf32>
    %c0_5 = arith.constant 0 : index
    %c1 = arith.constant 1 : index
    %c0_6 = arith.constant 0 : index
    %c0_7 = arith.constant 0 : index
    %5 = vector.load %arg2[%c0_5, %c1, %c0_6, %c0_7] : memref<4x4x8x128xf32, #tpu.memory_space<vmem>>, vector<1x1x8x128xf32>
    %6 = vector.shape_cast %5 : vector<1x1x8x128xf32> to vector<8x128xf32>
    %c0_8 = arith.constant 0 : index
    %c1_9 = arith.constant 1 : index
    %7 = memref.load %arg3[%c0_8, %c1_9] : memref<2x4xf32, #tpu.memory_space<smem>>
    %8 = vector.broadcast %7 : f32 to vector<8x128xf32>
    %9 = arith.mulf %6, %8 : vector<8x128xf32>
    %10 = arith.addf %4, %9 : vector<8x128xf32>
    %c0_10 = arith.constant 0 : index
    %c2 = arith.constant 2 : index
    %c0_11 = arith.constant 0 : index
    %c0_12 = arith.constant 0 : index
    %11 = vector.load %arg2[%c0_10, %c2, %c0_11, %c0_12] : memref<4x4x8x128xf32, #tpu.memory_space<vmem>>, vector<1x1x8x128xf32>
    %12 = vector.shape_cast %11 : vector<1x1x8x128xf32> to vector<8x128xf32>
    %c0_13 = arith.constant 0 : index
    %c2_14 = arith.constant 2 : index
    %13 = memref.load %arg3[%c0_13, %c2_14] : memref<2x4xf32, #tpu.memory_space<smem>>
    %14 = vector.broadcast %13 : f32 to vector<8x128xf32>
    %15 = arith.mulf %12, %14 : vector<8x128xf32>
    %16 = arith.addf %10, %15 : vector<8x128xf32>
    %c0_15 = arith.constant 0 : index
    %c3 = arith.constant 3 : index
    %c0_16 = arith.constant 0 : index
    %c0_17 = arith.constant 0 : index
    %17 = vector.load %arg2[%c0_15, %c3, %c0_16, %c0_17] : memref<4x4x8x128xf32, #tpu.memory_space<vmem>>, vector<1x1x8x128xf32>
    %18 = vector.shape_cast %17 : vector<1x1x8x128xf32> to vector<8x128xf32>
    %c0_18 = arith.constant 0 : index
    %c3_19 = arith.constant 3 : index
    %19 = memref.load %arg3[%c0_18, %c3_19] : memref<2x4xf32, #tpu.memory_space<smem>>
    %20 = vector.broadcast %19 : f32 to vector<8x128xf32>
    %21 = arith.mulf %18, %20 : vector<8x128xf32>
    %22 = arith.addf %16, %21 : vector<8x128xf32>
    %c0_20 = arith.constant 0 : index
    %c0_21 = arith.constant 0 : index
    %c0_22 = arith.constant 0 : index
    %c0_23 = arith.constant 0 : index
    %23 = vector.load %arg4[%c0_20, %c0_21, %c0_22, %c0_23] : memref<4x2x8x128xf32, #tpu.memory_space<vmem>>, vector<1x1x8x128xf32>
    %24 = vector.shape_cast %23 : vector<1x1x8x128xf32> to vector<8x128xf32>
    %25 = vector.shape_cast %22 : vector<8x128xf32> to vector<1x1x8x128xf32>
    tpu.vector_store %arg4[%c0_20, %c0_21, %c0_22, %c0_23], %25 {strides = array<i32>} : memref<4x2x8x128xf32, #tpu.memory_space<vmem>>, vector<1x1x8x128xf32>,
    %c0_24 = arith.constant 0 : index
    %c0_25 = arith.constant 0 : index
    %c0_26 = arith.constant 0 : index
    %c0_27 = arith.constant 0 : index
    %26 = vector.load %arg2[%c0_24, %c0_25, %c0_26, %c0_27] : memref<4x4x8x128xf32, #tpu.memory_space<vmem>>, vector<1x1x8x128xf32>
    %27 = vector.shape_cast %26 : vector<1x1x8x128xf32> to vector<8x128xf32>
    %c1_28 = arith.constant 1 : index
    %c0_29 = arith.constant 0 : index
    %28 = memref.load %arg3[%c1_28, %c0_29] : memref<2x4xf32, #tpu.memory_space<smem>>
    %29 = vector.broadcast %28 : f32 to vector<8x128xf32>
    %30 = arith.mulf %27, %29 : vector<8x128xf32>
    %c0_30 = arith.constant 0 : index
    %c1_31 = arith.constant 1 : index
    %c0_32 = arith.constant 0 : index
    %c0_33 = arith.constant 0 : index
    %31 = vector.load %arg2[%c0_30, %c1_31, %c0_32, %c0_33] : memref<4x4x8x128xf32, #tpu.memory_space<vmem>>, vector<1x1x8x128xf32>
    %32 = vector.shape_cast %31 : vector<1x1x8x128xf32> to vector<8x128xf32>
    %c1_34 = arith.constant 1 : index
    %c1_35 = arith.constant 1 : index
    %33 = memref.load %arg3[%c1_34, %c1_35] : memref<2x4xf32, #tpu.memory_space<smem>>
    %34 = vector.broadcast %33 : f32 to vector<8x128xf32>
    %35 = arith.mulf %32, %34 : vector<8x128xf32>
    %36 = arith.addf %30, %35 : vector<8x128xf32>
    %c0_36 = arith.constant 0 : index
    %c2_37 = arith.constant 2 : index
    %c0_38 = arith.constant 0 : index
    %c0_39 = arith.constant 0 : index
    %37 = vector.load %arg2[%c0_36, %c2_37, %c0_38, %c0_39] : memref<4x4x8x128xf32, #tpu.memory_space<vmem>>, vector<1x1x8x128xf32>
    %38 = vector.shape_cast %37 : vector<1x1x8x128xf32> to vector<8x128xf32>
    %c1_40 = arith.constant 1 : index
    %c2_41 = arith.constant 2 : index
    %39 = memref.load %arg3[%c1_40, %c2_41] : memref<2x4xf32, #tpu.memory_space<smem>>
    %40 = vector.broadcast %39 : f32 to vector<8x128xf32>
    %41 = arith.mulf %38, %40 : vector<8x128xf32>
    %42 = arith.addf %36, %41 : vector<8x128xf32>
    %c0_42 = arith.constant 0 : index
    %c3_43 = arith.constant 3 : index
    %c0_44 = arith.constant 0 : index
    %c0_45 = arith.constant 0 : index
    %43 = vector.load %arg2[%c0_42, %c3_43, %c0_44, %c0_45] : memref<4x4x8x128xf32, #tpu.memory_space<vmem>>, vector<1x1x8x128xf32>
    %44 = vector.shape_cast %43 : vector<1x1x8x128xf32> to vector<8x128xf32>
    %c1_46 = arith.constant 1 : index
    %c3_47 = arith.constant 3 : index
    %45 = memref.load %arg3[%c1_46, %c3_47] : memref<2x4xf32, #tpu.memory_space<smem>>
    %46 = vector.broadcast %45 : f32 to vector<8x128xf32>
    %47 = arith.mulf %44, %46 : vector<8x128xf32>
    %48 = arith.addf %42, %47 : vector<8x128xf32>
    %c0_48 = arith.constant 0 : index
    %c1_49 = arith.constant 1 : index
    %c0_50 = arith.constant 0 : index
    %c0_51 = arith.constant 0 : index
    %49 = vector.load %arg4[%c0_48, %c1_49, %c0_50, %c0_51] : memref<4x2x8x128xf32, #tpu.memory_space<vmem>>, vector<1x1x8x128xf32>
    %50 = vector.shape_cast %49 : vector<1x1x8x128xf32> to vector<8x128xf32>
    %51 = vector.shape_cast %48 : vector<8x128xf32> to vector<1x1x8x128xf32>
    tpu.vector_store %arg4[%c0_48, %c1_49, %c0_50, %c0_51], %51 {strides = array<i32>} : memref<4x2x8x128xf32, #tpu.memory_space<vmem>>, vector<1x1x8x128xf32>,
    %c1_52 = arith.constant 1 : index
    %c0_53 = arith.constant 0 : index
    %c0_54 = arith.constant 0 : index
    %c0_55 = arith.constant 0 : index
    %52 = vector.load %arg2[%c1_52, %c0_53, %c0_54, %c0_55] : memref<4x4x8x128xf32, #tpu.memory_space<vmem>>, vector<1x1x8x128xf32>
    %53 = vector.shape_cast %52 : vector<1x1x8x128xf32> to vector<8x128xf32>
    %c0_56 = arith.constant 0 : index
    %c0_57 = arith.constant 0 : index
    %54 = memref.load %arg3[%c0_56, %c0_57] : memref<2x4xf32, #tpu.memory_space<smem>>
    %55 = vector.broadcast %54 : f32 to vector<8x128xf32>
    %56 = arith.mulf %53, %55 : vector<8x128xf32>
    %c1_58 = arith.constant 1 : index
    %c1_59 = arith.constant 1 : index
    %c0_60 = arith.constant 0 : index
    %c0_61 = arith.constant 0 : index
    %57 = vector.load %arg2[%c1_58, %c1_59, %c0_60, %c0_61] : memref<4x4x8x128xf32, #tpu.memory_space<vmem>>, vector<1x1x8x128xf32>
    %58 = vector.shape_cast %57 : vector<1x1x8x128xf32> to vector<8x128xf32>
    %c0_62 = arith.constant 0 : index
    %c1_63 = arith.constant 1 : index
    %59 = memref.load %arg3[%c0_62, %c1_63] : memref<2x4xf32, #tpu.memory_space<smem>>
    %60 = vector.broadcast %59 : f32 to vector<8x128xf32>
    %61 = arith.mulf %58, %60 : vector<8x128xf32>
    %62 = arith.addf %56, %61 : vector<8x128xf32>
    %c1_64 = arith.constant 1 : index
    %c2_65 = arith.constant 2 : index
    %c0_66 = arith.constant 0 : index
    %c0_67 = arith.constant 0 : index
    %63 = vector.load %arg2[%c1_64, %c2_65, %c0_66, %c0_67] : memref<4x4x8x128xf32, #tpu.memory_space<vmem>>, vector<1x1x8x128xf32>
    %64 = vector.shape_cast %63 : vector<1x1x8x128xf32> to vector<8x128xf32>
    %c0_68 = arith.constant 0 : index
    %c2_69 = arith.constant 2 : index
    %65 = memref.load %arg3[%c0_68, %c2_69] : memref<2x4xf32, #tpu.memory_space<smem>>
    %66 = vector.broadcast %65 : f32 to vector<8x128xf32>
    %67 = arith.mulf %64, %66 : vector<8x128xf32>
    %68 = arith.addf %62, %67 : vector<8x128xf32>
    %c1_70 = arith.constant 1 : index
    %c3_71 = arith.constant 3 : index
    %c0_72 = arith.constant 0 : index
    %c0_73 = arith.constant 0 : index
    %69 = vector.load %arg2[%c1_70, %c3_71, %c0_72, %c0_73] : memref<4x4x8x128xf32, #tpu.memory_space<vmem>>, vector<1x1x8x128xf32>
    %70 = vector.shape_cast %69 : vector<1x1x8x128xf32> to vector<8x128xf32>
    %c0_74 = arith.constant 0 : index
    %c3_75 = arith.constant 3 : index
    %71 = memref.load %arg3[%c0_74, %c3_75] : memref<2x4xf32, #tpu.memory_space<smem>>
    %72 = vector.broadcast %71 : f32 to vector<8x128xf32>
    %73 = arith.mulf %70, %72 : vector<8x128xf32>
    %74 = arith.addf %68, %73 : vector<8x128xf32>
    %c1_76 = arith.constant 1 : index
    %c0_77 = arith.constant 0 : index
    %c0_78 = arith.constant 0 : index
    %c0_79 = arith.constant 0 : index
    %75 = vector.load %arg4[%c1_76, %c0_77, %c0_78, %c0_79] : memref<4x2x8x128xf32, #tpu.memory_space<vmem>>, vector<1x1x8x128xf32>
    %76 = vector.shape_cast %75 : vector<1x1x8x128xf32> to vector<8x128xf32>
    %77 = vector.shape_cast %74 : vector<8x128xf32> to vector<1x1x8x128xf32>
    tpu.vector_store %arg4[%c1_76, %c0_77, %c0_78, %c0_79], %77 {strides = array<i32>} : memref<4x2x8x128xf32, #tpu.memory_space<vmem>>, vector<1x1x8x128xf32>,
    %c1_80 = arith.constant 1 : index
    %c0_81 = arith.constant 0 : index
    %c0_82 = arith.constant 0 : index
    %c0_83 = arith.constant 0 : index
    %78 = vector.load %arg2[%c1_80, %c0_81, %c0_82, %c0_83] : memref<4x4x8x128xf32, #tpu.memory_space<vmem>>, vector<1x1x8x128xf32>
    %79 = vector.shape_cast %78 : vector<1x1x8x128xf32> to vector<8x128xf32>
    %c1_84 = arith.constant 1 : index
    %c0_85 = arith.constant 0 : index
    %80 = memref.load %arg3[%c1_84, %c0_85] : memref<2x4xf32, #tpu.memory_space<smem>>
    %81 = vector.broadcast %80 : f32 to vector<8x128xf32>
    %82 = arith.mulf %79, %81 : vector<8x128xf32>
    %c1_86 = arith.constant 1 : index
    %c1_87 = arith.constant 1 : index
    %c0_88 = arith.constant 0 : index
    %c0_89 = arith.constant 0 : index
    %83 = vector.load %arg2[%c1_86, %c1_87, %c0_88, %c0_89] : memref<4x4x8x128xf32, #tpu.memory_space<vmem>>, vector<1x1x8x128xf32>
    %84 = vector.shape_cast %83 : vector<1x1x8x128xf32> to vector<8x128xf32>
    %c1_90 = arith.constant 1 : index
    %c1_91 = arith.constant 1 : index
    %85 = memref.load %arg3[%c1_90, %c1_91] : memref<2x4xf32, #tpu.memory_space<smem>>
    %86 = vector.broadcast %85 : f32 to vector<8x128xf32>
    %87 = arith.mulf %84, %86 : vector<8x128xf32>
    %88 = arith.addf %82, %87 : vector<8x128xf32>
    %c1_92 = arith.constant 1 : index
    %c2_93 = arith.constant 2 : index
    %c0_94 = arith.constant 0 : index
    %c0_95 = arith.constant 0 : index
    %89 = vector.load %arg2[%c1_92, %c2_93, %c0_94, %c0_95] : memref<4x4x8x128xf32, #tpu.memory_space<vmem>>, vector<1x1x8x128xf32>
    %90 = vector.shape_cast %89 : vector<1x1x8x128xf32> to vector<8x128xf32>
    %c1_96 = arith.constant 1 : index
    %c2_97 = arith.constant 2 : index
    %91 = memref.load %arg3[%c1_96, %c2_97] : memref<2x4xf32, #tpu.memory_space<smem>>
    %92 = vector.broadcast %91 : f32 to vector<8x128xf32>
    %93 = arith.mulf %90, %92 : vector<8x128xf32>
    %94 = arith.addf %88, %93 : vector<8x128xf32>
    %c1_98 = arith.constant 1 : index
    %c3_99 = arith.constant 3 : index
    %c0_100 = arith.constant 0 : index
    %c0_101 = arith.constant 0 : index
    %95 = vector.load %arg2[%c1_98, %c3_99, %c0_100, %c0_101] : memref<4x4x8x128xf32, #tpu.memory_space<vmem>>, vector<1x1x8x128xf32>
    %96 = vector.shape_cast %95 : vector<1x1x8x128xf32> to vector<8x128xf32>
    %c1_102 = arith.constant 1 : index
    %c3_103 = arith.constant 3 : index
    %97 = memref.load %arg3[%c1_102, %c3_103] : memref<2x4xf32, #tpu.memory_space<smem>>
    %98 = vector.broadcast %97 : f32 to vector<8x128xf32>
    %99 = arith.mulf %96, %98 : vector<8x128xf32>
    %100 = arith.addf %94, %99 : vector<8x128xf32>
    %c1_104 = arith.constant 1 : index
    %c1_105 = arith.constant 1 : index
    %c0_106 = arith.constant 0 : index
    %c0_107 = arith.constant 0 : index
    %101 = vector.load %arg4[%c1_104, %c1_105, %c0_106, %c0_107] : memref<4x2x8x128xf32, #tpu.memory_space<vmem>>, vector<1x1x8x128xf32>
    %102 = vector.shape_cast %101 : vector<1x1x8x128xf32> to vector<8x128xf32>
    %103 = vector.shape_cast %100 : vector<8x128xf32> to vector<1x1x8x128xf32>
    tpu.vector_store %arg4[%c1_104, %c1_105, %c0_106, %c0_107], %103 {strides = array<i32>} : memref<4x2x8x128xf32, #tpu.memory_space<vmem>>, vector<1x1x8x128xf32>,
    %c2_108 = arith.constant 2 : index
    %c0_109 = arith.constant 0 : index
    %c0_110 = arith.constant 0 : index
    %c0_111 = arith.constant 0 : index
    %104 = vector.load %arg2[%c2_108, %c0_109, %c0_110, %c0_111] : memref<4x4x8x128xf32, #tpu.memory_space<vmem>>, vector<1x1x8x128xf32>
    %105 = vector.shape_cast %104 : vector<1x1x8x128xf32> to vector<8x128xf32>
    %c0_112 = arith.constant 0 : index
    %c0_113 = arith.constant 0 : index
    %106 = memref.load %arg3[%c0_112, %c0_113] : memref<2x4xf32, #tpu.memory_space<smem>>
    %107 = vector.broadcast %106 : f32 to vector<8x128xf32>
    %108 = arith.mulf %105, %107 : vector<8x128xf32>
    %c2_114 = arith.constant 2 : index
    %c1_115 = arith.constant 1 : index
    %c0_116 = arith.constant 0 : index
    %c0_117 = arith.constant 0 : index
    %109 = vector.load %arg2[%c2_114, %c1_115, %c0_116, %c0_117] : memref<4x4x8x128xf32, #tpu.memory_space<vmem>>, vector<1x1x8x128xf32>
    %110 = vector.shape_cast %109 : vector<1x1x8x128xf32> to vector<8x128xf32>
    %c0_118 = arith.constant 0 : index
    %c1_119 = arith.constant 1 : index
    %111 = memref.load %arg3[%c0_118, %c1_119] : memref<2x4xf32, #tpu.memory_space<smem>>
    %112 = vector.broadcast %111 : f32 to vector<8x128xf32>
    %113 = arith.mulf %110, %112 : vector<8x128xf32>
    %114 = arith.addf %108, %113 : vector<8x128xf32>
    %c2_120 = arith.constant 2 : index
    %c2_121 = arith.constant 2 : index
    %c0_122 = arith.constant 0 : index
    %c0_123 = arith.constant 0 : index
    %115 = vector.load %arg2[%c2_120, %c2_121, %c0_122, %c0_123] : memref<4x4x8x128xf32, #tpu.memory_space<vmem>>, vector<1x1x8x128xf32>
    %116 = vector.shape_cast %115 : vector<1x1x8x128xf32> to vector<8x128xf32>
    %c0_124 = arith.constant 0 : index
    %c2_125 = arith.constant 2 : index
    %117 = memref.load %arg3[%c0_124, %c2_125] : memref<2x4xf32, #tpu.memory_space<smem>>
    %118 = vector.broadcast %117 : f32 to vector<8x128xf32>
    %119 = arith.mulf %116, %118 : vector<8x128xf32>
    %120 = arith.addf %114, %119 : vector<8x128xf32>
    %c2_126 = arith.constant 2 : index
    %c3_127 = arith.constant 3 : index
    %c0_128 = arith.constant 0 : index
    %c0_129 = arith.constant 0 : index
    %121 = vector.load %arg2[%c2_126, %c3_127, %c0_128, %c0_129] : memref<4x4x8x128xf32, #tpu.memory_space<vmem>>, vector<1x1x8x128xf32>
    %122 = vector.shape_cast %121 : vector<1x1x8x128xf32> to vector<8x128xf32>
    %c0_130 = arith.constant 0 : index
    %c3_131 = arith.constant 3 : index
    %123 = memref.load %arg3[%c0_130, %c3_131] : memref<2x4xf32, #tpu.memory_space<smem>>
    %124 = vector.broadcast %123 : f32 to vector<8x128xf32>
    %125 = arith.mulf %122, %124 : vector<8x128xf32>
    %126 = arith.addf %120, %125 : vector<8x128xf32>
    %c2_132 = arith.constant 2 : index
    %c0_133 = arith.constant 0 : index
    %c0_134 = arith.constant 0 : index
    %c0_135 = arith.constant 0 : index
    %127 = vector.load %arg4[%c2_132, %c0_133, %c0_134, %c0_135] : memref<4x2x8x128xf32, #tpu.memory_space<vmem>>, vector<1x1x8x128xf32>
    %128 = vector.shape_cast %127 : vector<1x1x8x128xf32> to vector<8x128xf32>
    %129 = vector.shape_cast %126 : vector<8x128xf32> to vector<1x1x8x128xf32>
    tpu.vector_store %arg4[%c2_132, %c0_133, %c0_134, %c0_135], %129 {strides = array<i32>} : memref<4x2x8x128xf32, #tpu.memory_space<vmem>>, vector<1x1x8x128xf32>,
    %c2_136 = arith.constant 2 : index
    %c0_137 = arith.constant 0 : index
    %c0_138 = arith.constant 0 : index
    %c0_139 = arith.constant 0 : index
    %130 = vector.load %arg2[%c2_136, %c0_137, %c0_138, %c0_139] : memref<4x4x8x128xf32, #tpu.memory_space<vmem>>, vector<1x1x8x128xf32>
    %131 = vector.shape_cast %130 : vector<1x1x8x128xf32> to vector<8x128xf32>
    %c1_140 = arith.constant 1 : index
    %c0_141 = arith.constant 0 : index
    %132 = memref.load %arg3[%c1_140, %c0_141] : memref<2x4xf32, #tpu.memory_space<smem>>
    %133 = vector.broadcast %132 : f32 to vector<8x128xf32>
    %134 = arith.mulf %131, %133 : vector<8x128xf32>
    %c2_142 = arith.constant 2 : index
    %c1_143 = arith.constant 1 : index
    %c0_144 = arith.constant 0 : index
    %c0_145 = arith.constant 0 : index
    %135 = vector.load %arg2[%c2_142, %c1_143, %c0_144, %c0_145] : memref<4x4x8x128xf32, #tpu.memory_space<vmem>>, vector<1x1x8x128xf32>
    %136 = vector.shape_cast %135 : vector<1x1x8x128xf32> to vector<8x128xf32>
    %c1_146 = arith.constant 1 : index
    %c1_147 = arith.constant 1 : index
    %137 = memref.load %arg3[%c1_146, %c1_147] : memref<2x4xf32, #tpu.memory_space<smem>>
    %138 = vector.broadcast %137 : f32 to vector<8x128xf32>
    %139 = arith.mulf %136, %138 : vector<8x128xf32>
    %140 = arith.addf %134, %139 : vector<8x128xf32>
    %c2_148 = arith.constant 2 : index
    %c2_149 = arith.constant 2 : index
    %c0_150 = arith.constant 0 : index
    %c0_151 = arith.constant 0 : index
    %141 = vector.load %arg2[%c2_148, %c2_149, %c0_150, %c0_151] : memref<4x4x8x128xf32, #tpu.memory_space<vmem>>, vector<1x1x8x128xf32>
    %142 = vector.shape_cast %141 : vector<1x1x8x128xf32> to vector<8x128xf32>
    %c1_152 = arith.constant 1 : index
    %c2_153 = arith.constant 2 : index
    %143 = memref.load %arg3[%c1_152, %c2_153] : memref<2x4xf32, #tpu.memory_space<smem>>
    %144 = vector.broadcast %143 : f32 to vector<8x128xf32>
    %145 = arith.mulf %142, %144 : vector<8x128xf32>
    %146 = arith.addf %140, %145 : vector<8x128xf32>
    %c2_154 = arith.constant 2 : index
    %c3_155 = arith.constant 3 : index
    %c0_156 = arith.constant 0 : index
    %c0_157 = arith.constant 0 : index
    %147 = vector.load %arg2[%c2_154, %c3_155, %c0_156, %c0_157] : memref<4x4x8x128xf32, #tpu.memory_space<vmem>>, vector<1x1x8x128xf32>
    %148 = vector.shape_cast %147 : vector<1x1x8x128xf32> to vector<8x128xf32>
    %c1_158 = arith.constant 1 : index
    %c3_159 = arith.constant 3 : index
    %149 = memref.load %arg3[%c1_158, %c3_159] : memref<2x4xf32, #tpu.memory_space<smem>>
    %150 = vector.broadcast %149 : f32 to vector<8x128xf32>
    %151 = arith.mulf %148, %150 : vector<8x128xf32>
    %152 = arith.addf %146, %151 : vector<8x128xf32>
    %c2_160 = arith.constant 2 : index
    %c1_161 = arith.constant 1 : index
    %c0_162 = arith.constant 0 : index
    %c0_163 = arith.constant 0 : index
    %153 = vector.load %arg4[%c2_160, %c1_161, %c0_162, %c0_163] : memref<4x2x8x128xf32, #tpu.memory_space<vmem>>, vector<1x1x8x128xf32>
    %154 = vector.shape_cast %153 : vector<1x1x8x128xf32> to vector<8x128xf32>
    %155 = vector.shape_cast %152 : vector<8x128xf32> to vector<1x1x8x128xf32>
    tpu.vector_store %arg4[%c2_160, %c1_161, %c0_162, %c0_163], %155 {strides = array<i32>} : memref<4x2x8x128xf32, #tpu.memory_space<vmem>>, vector<1x1x8x128xf32>,
    %c3_164 = arith.constant 3 : index
    %c0_165 = arith.constant 0 : index
    %c0_166 = arith.constant 0 : index
    %c0_167 = arith.constant 0 : index
    %156 = vector.load %arg2[%c3_164, %c0_165, %c0_166, %c0_167] : memref<4x4x8x128xf32, #tpu.memory_space<vmem>>, vector<1x1x8x128xf32>
    %157 = vector.shape_cast %156 : vector<1x1x8x128xf32> to vector<8x128xf32>
    %c0_168 = arith.constant 0 : index
    %c0_169 = arith.constant 0 : index
    %158 = memref.load %arg3[%c0_168, %c0_169] : memref<2x4xf32, #tpu.memory_space<smem>>
    %159 = vector.broadcast %158 : f32 to vector<8x128xf32>
    %160 = arith.mulf %157, %159 : vector<8x128xf32>
    %c3_170 = arith.constant 3 : index
    %c1_171 = arith.constant 1 : index
    %c0_172 = arith.constant 0 : index
    %c0_173 = arith.constant 0 : index
    %161 = vector.load %arg2[%c3_170, %c1_171, %c0_172, %c0_173] : memref<4x4x8x128xf32, #tpu.memory_space<vmem>>, vector<1x1x8x128xf32>
    %162 = vector.shape_cast %161 : vector<1x1x8x128xf32> to vector<8x128xf32>
    %c0_174 = arith.constant 0 : index
    %c1_175 = arith.constant 1 : index
    %163 = memref.load %arg3[%c0_174, %c1_175] : memref<2x4xf32, #tpu.memory_space<smem>>
    %164 = vector.broadcast %163 : f32 to vector<8x128xf32>
    %165 = arith.mulf %162, %164 : vector<8x128xf32>
    %166 = arith.addf %160, %165 : vector<8x128xf32>
    %c3_176 = arith.constant 3 : index
    %c2_177 = arith.constant 2 : index
    %c0_178 = arith.constant 0 : index
    %c0_179 = arith.constant 0 : index
    %167 = vector.load %arg2[%c3_176, %c2_177, %c0_178, %c0_179] : memref<4x4x8x128xf32, #tpu.memory_space<vmem>>, vector<1x1x8x128xf32>
    %168 = vector.shape_cast %167 : vector<1x1x8x128xf32> to vector<8x128xf32>
    %c0_180 = arith.constant 0 : index
    %c2_181 = arith.constant 2 : index
    %169 = memref.load %arg3[%c0_180, %c2_181] : memref<2x4xf32, #tpu.memory_space<smem>>
    %170 = vector.broadcast %169 : f32 to vector<8x128xf32>
    %171 = arith.mulf %168, %170 : vector<8x128xf32>
    %172 = arith.addf %166, %171 : vector<8x128xf32>
    %c3_182 = arith.constant 3 : index
    %c3_183 = arith.constant 3 : index
    %c0_184 = arith.constant 0 : index
    %c0_185 = arith.constant 0 : index
    %173 = vector.load %arg2[%c3_182, %c3_183, %c0_184, %c0_185] : memref<4x4x8x128xf32, #tpu.memory_space<vmem>>, vector<1x1x8x128xf32>
    %174 = vector.shape_cast %173 : vector<1x1x8x128xf32> to vector<8x128xf32>
    %c0_186 = arith.constant 0 : index
    %c3_187 = arith.constant 3 : index
    %175 = memref.load %arg3[%c0_186, %c3_187] : memref<2x4xf32, #tpu.memory_space<smem>>
    %176 = vector.broadcast %175 : f32 to vector<8x128xf32>
    %177 = arith.mulf %174, %176 : vector<8x128xf32>
    %178 = arith.addf %172, %177 : vector<8x128xf32>
    %c3_188 = arith.constant 3 : index
    %c0_189 = arith.constant 0 : index
    %c0_190 = arith.constant 0 : index
    %c0_191 = arith.constant 0 : index
    %179 = vector.load %arg4[%c3_188, %c0_189, %c0_190, %c0_191] : memref<4x2x8x128xf32, #tpu.memory_space<vmem>>, vector<1x1x8x128xf32>
    %180 = vector.shape_cast %179 : vector<1x1x8x128xf32> to vector<8x128xf32>
    %181 = vector.shape_cast %178 : vector<8x128xf32> to vector<1x1x8x128xf32>
    tpu.vector_store %arg4[%c3_188, %c0_189, %c0_190, %c0_191], %181 {strides = array<i32>} : memref<4x2x8x128xf32, #tpu.memory_space<vmem>>, vector<1x1x8x128xf32>,
    %c3_192 = arith.constant 3 : index
    %c0_193 = arith.constant 0 : index
    %c0_194 = arith.constant 0 : index
    %c0_195 = arith.constant 0 : index
    %182 = vector.load %arg2[%c3_192, %c0_193, %c0_194, %c0_195] : memref<4x4x8x128xf32, #tpu.memory_space<vmem>>, vector<1x1x8x128xf32>
    %183 = vector.shape_cast %182 : vector<1x1x8x128xf32> to vector<8x128xf32>
    %c1_196 = arith.constant 1 : index
    %c0_197 = arith.constant 0 : index
    %184 = memref.load %arg3[%c1_196, %c0_197] : memref<2x4xf32, #tpu.memory_space<smem>>
    %185 = vector.broadcast %184 : f32 to vector<8x128xf32>
    %186 = arith.mulf %183, %185 : vector<8x128xf32>
    %c3_198 = arith.constant 3 : index
    %c1_199 = arith.constant 1 : index
    %c0_200 = arith.constant 0 : index
    %c0_201 = arith.constant 0 : index
    %187 = vector.load %arg2[%c3_198, %c1_199, %c0_200, %c0_201] : memref<4x4x8x128xf32, #tpu.memory_space<vmem>>, vector<1x1x8x128xf32>
    %188 = vector.shape_cast %187 : vector<1x1x8x128xf32> to vector<8x128xf32>
    %c1_202 = arith.constant 1 : index
    %c1_203 = arith.constant 1 : index
    %189 = memref.load %arg3[%c1_202, %c1_203] : memref<2x4xf32, #tpu.memory_space<smem>>
    %190 = vector.broadcast %189 : f32 to vector<8x128xf32>
    %191 = arith.mulf %188, %190 : vector<8x128xf32>
    %192 = arith.addf %186, %191 : vector<8x128xf32>
    %c3_204 = arith.constant 3 : index
    %c2_205 = arith.constant 2 : index
    %c0_206 = arith.constant 0 : index
    %c0_207 = arith.constant 0 : index
    %193 = vector.load %arg2[%c3_204, %c2_205, %c0_206, %c0_207] : memref<4x4x8x128xf32, #tpu.memory_space<vmem>>, vector<1x1x8x128xf32>
    %194 = vector.shape_cast %193 : vector<1x1x8x128xf32> to vector<8x128xf32>
    %c1_208 = arith.constant 1 : index
    %c2_209 = arith.constant 2 : index
    %195 = memref.load %arg3[%c1_208, %c2_209] : memref<2x4xf32, #tpu.memory_space<smem>>
    %196 = vector.broadcast %195 : f32 to vector<8x128xf32>
    %197 = arith.mulf %194, %196 : vector<8x128xf32>
    %198 = arith.addf %192, %197 : vector<8x128xf32>
    %c3_210 = arith.constant 3 : index
    %c3_211 = arith.constant 3 : index
    %c0_212 = arith.constant 0 : index
    %c0_213 = arith.constant 0 : index
    %199 = vector.load %arg2[%c3_210, %c3_211, %c0_212, %c0_213] : memref<4x4x8x128xf32, #tpu.memory_space<vmem>>, vector<1x1x8x128xf32>
    %200 = vector.shape_cast %199 : vector<1x1x8x128xf32> to vector<8x128xf32>
    %c1_214 = arith.constant 1 : index
    %c3_215 = arith.constant 3 : index
    %201 = memref.load %arg3[%c1_214, %c3_215] : memref<2x4xf32, #tpu.memory_space<smem>>
    %202 = vector.broadcast %201 : f32 to vector<8x128xf32>
    %203 = arith.mulf %200, %202 : vector<8x128xf32>
    %204 = arith.addf %198, %203 : vector<8x128xf32>
    %c3_216 = arith.constant 3 : index
    %c1_217 = arith.constant 1 : index
    %c0_218 = arith.constant 0 : index
    %c0_219 = arith.constant 0 : index
    %205 = vector.load %arg4[%c3_216, %c1_217, %c0_218, %c0_219] : memref<4x2x8x128xf32, #tpu.memory_space<vmem>>, vector<1x1x8x128xf32>
    %206 = vector.shape_cast %205 : vector<1x1x8x128xf32> to vector<8x128xf32>
    %207 = vector.shape_cast %204 : vector<8x128xf32> to vector<1x1x8x128xf32>
    tpu.vector_store %arg4[%c3_216, %c1_217, %c0_218, %c0_219], %207 {strides = array<i32>} : memref<4x2x8x128xf32, #tpu.memory_space<vmem>>, vector<1x1x8x128xf32>,
    return
  }
  func.func @transform_0(%arg0: i32, %arg1: i32) -> (i32, i32, i32, i32) {
    %c0_i32 = arith.constant 0 : i32
    %c0_i32_0 = arith.constant 0 : i32
    %c0_i32_1 = arith.constant 0 : i32
    return %arg0, %c0_i32, %arg1, %c0_i32_0 : i32, i32, i32, i32
  }
  func.func @transform_1(%arg0: i32, %arg1: i32) -> (i32, i32) {
    %c0_i32 = arith.constant 0 : i32
    %c0_i32_0 = arith.constant 0 : i32
    %c0_i32_1 = arith.constant 0 : i32
    return %c0_i32, %c0_i32_0 : i32, i32
  }
  func.func @transform_2(%arg0: i32, %arg1: i32) -> (i32, i32, i32, i32) {
    %c0_i32 = arith.constant 0 : i32
    %c0_i32_0 = arith.constant 0 : i32
    %c0_i32_1 = arith.constant 0 : i32
    return %arg0, %c0_i32, %arg1, %c0_i32_0 : i32, i32, i32, i32
  }
}

</mosaic_0001>

<bundles_post_ra>
// kernel: conv1x1_pad1.1
= control target key start
LH: loop header
LB: loop body
LE: loop exit
PB: predicated region body
PF: predicated region fallthrough
CT: control target
= control target key end

     0   :  { %7 = vsyncpa [#allocation3], 0  ;;  %s382_s0 = inlined_call_operand.vmem [shape: f32[4,4,8,128], index: 0, kind: input, shape index: {}]   ;;  %s383_s1 = inlined_call_operand.vmem [shape: f32[2,4], index: 1, kind: input, shape index: {}]   ;;  %s384_s2 = inlined_call_operand.vmem [shape: f32[4,2,8,128], index: 2, kind: output, shape index: {}]  }
   0x1   :  { %s16_s11 = sshll.u32 %s383_s1, 4  ;;  %s17_s11 = int_to_ptr.vmem [resolvable:$true] %s16_s11 }
   0x2   :  { %s277_s12 = scalar_lea.vmem %s17_s11, 32  ;;  %p282_p1 = scmp.lt.s32.totalorder %s17_s11, %s17_s11 }
   0x3   :  { %p278_p0 = scmp.ne.s32.totalorder %s17_s11, %s277_s12  ;;  %p283_p2 = scmp.lt.s32.totalorder %s277_s12, %s277_s12 }
   0x5   :  { %p284_p3 = por %p283_p2, %p282_p1 }
   0x7   :  { %p285_p4 = pnand %p284_p3, %p278_p0 }
   0x9   :  { %288 = shalt.err (!%p285_p4)
}
   0xa   :  { %s291_s13 = smov [#allocation2]  }
   0xb   :  { %19 = dma.vmem_to_smem %s17_s11, 32, %s291_s13, [#allocation3]  }
   0xc   :  { %289 = dma.done.wait [#allocation3], 32  }
   0xd   :  { %290 = vsyncadd [#allocation3], 4294967264 }
   0xe   :  { %23 = sfence }
   0xf   :  { %s25_s14 = sld [smem:[#allocation2]]  ;;  %s212_s15 = sld [smem:[#allocation2 + $0x1]]  ;;  %v24_v0 = vld [vmem:[%s382_s0] sm:$0xff]  ;;  %v211_v1 = vld [vmem:[%s382_s0 + $0x8] sm:$0xff]  ;;  %v213_v2 = vld [vmem:[%s382_s0 + $0x10] sm:$0xff] }
  0x10   :  { %s214_s16 = sld [smem:[#allocation2 + $0x2]]  ;;  %s216_s17 = sld [smem:[#allocation2 + $0x3]]  ;;  %v215_v3 = vld [vmem:[%s382_s0 + $0x18] sm:$0xff]  ;;  %v225_v10 = vld [vmem:[%s382_s0 + $0x20] sm:$0xff]  ;;  %v226_v11 = vld [vmem:[%s382_s0 + $0x28] sm:$0xff] }
  0x11   :  { %s217_s18 = sld [smem:[#allocation2 + $0x80]]  ;;  %s219_s19 = sld [smem:[#allocation2 + $0x81]]  ;;  %v228_v16 = vld [vmem:[%s382_s0 + $0x30] sm:$0xff]  ;;  %v230_v21 = vld [vmem:[%s382_s0 + $0x38] sm:$0xff]  ;;  %v242_v30 = vld [vmem:[%s382_s0 + $0x40] sm:$0xff] }
  0x12   :  { %s221_s1 = sld [smem:[#allocation2 + $0x82]]  ;;  %s223_s20 = sld [smem:[#allocation2 + $0x83]]  ;;  %v243_v31 = vld [vmem:[%s382_s0 + $0x48] sm:$0xff]  ;;  %v245_v36 = vld [vmem:[%s382_s0 + $0x50] sm:$0xff]  ;;  %v247_v37 = vld [vmem:[%s382_s0 + $0x58] sm:$0xff] }
  0x13   :  { %v259_v46 = vld [vmem:[%s382_s0 + $0x60] sm:$0xff]  ;;  %v260_v47 = vld [vmem:[%s382_s0 + $0x68] sm:$0xff]  ;;  %v262_v52 = vld [vmem:[%s382_s0 + $0x70] sm:$0xff] }
  0x14   :  { %v264_v57 = vld [vmem:[%s382_s0 + $0x78] sm:$0xff] }
  0x15   :  { %v26_v4 = vstv %s25_s14  ;;  %v31_v5 = vstv %s212_s15 }
  0x16   :  { %v27_v6 = vmul.f32 %v26_v4, %v24_v0  ;;  %v32_v7 = vmul.f32 %v211_v1, %v31_v5  ;;  %v37_v8 = vstv %s214_s16  ;;  %v43_v9 = vstv %s216_s17 }
  0x17   :  { %v38_v12 = vmul.f32 %v213_v2, %v37_v8  ;;  %v44_v13 = vmul.f32 %v215_v3, %v43_v9  ;;  %v49_v14 = vstv %s217_s18  ;;  %v53_v15 = vstv %s219_s19 }
  0x18   :  { %v33_v17 = vadd.f32 %v32_v7, %v27_v6  ;;  %v50_v18 = vmul.f32 %v49_v14, %v24_v0  ;;  %v54_v19 = vmul.f32 %v211_v1, %v53_v15  ;;  %v58_v20 = vstv %s221_s1 }
  0x19   :  { %v59_v22 = vmul.f32 %v213_v2, %v58_v20  ;;  %v63_v23 = vstv %s223_s20  ;;  %v72_v24 = vmul.f32 %v225_v10, %v26_v4  ;;  %v77_v25 = vmul.f32 %v226_v11, %v31_v5 }
  0x1a   :  { %v39_v26 = vadd.f32 %v38_v12, %v33_v17  ;;  %v55_v27 = vadd.f32 %v54_v19, %v50_v18  ;;  %v64_v28 = vmul.f32 %v215_v3, %v63_v23  ;;  %v83_v29 = vmul.f32 %v228_v16, %v37_v8 }
  0x1b   :  { %v78_v32 = vadd.f32 %v77_v25, %v72_v24  ;;  %v89_v33 = vmul.f32 %v230_v21, %v43_v9  ;;  %v96_v34 = vmul.f32 %v225_v10, %v49_v14  ;;  %v100_v35 = vmul.f32 %v226_v11, %v53_v15 }
  0x1c   :  { %v45_v38 = vadd.f32 %v44_v13, %v39_v26  ;;  %v60_v39 = vadd.f32 %v59_v22, %v55_v27  ;;  %v105_v40 = vmul.f32 %v228_v16, %v58_v20  ;;  %v110_v41 = vmul.f32 %v230_v21, %v63_v23 }
  0x1d   :  { %v84_v42 = vadd.f32 %v83_v29, %v78_v32  ;;  %v101_v43 = vadd.f32 %v100_v35, %v96_v34  ;;  %v118_v44 = vmul.f32 %v242_v30, %v26_v4  ;;  %v123_v45 = vmul.f32 %v243_v31, %v31_v5 }
  0x1e   :  { %46 = vst [vmem:[%s384_s2] sm:$0xff] %v45_v38  ;;  %v65_v48 = vadd.f32 %v64_v28, %v60_v39  ;;  %v129_v49 = vmul.f32 %v245_v36, %v37_v8  ;;  %v135_v50 = vmul.f32 %v247_v37, %v43_v9  ;;  %v142_v51 = vmul.f32 %v242_v30, %v49_v14 }
  0x1f   :  { %v90_v53 = vadd.f32 %v89_v33, %v84_v42  ;;  %v106_v54 = vadd.f32 %v105_v40, %v101_v43  ;;  %v124_v55 = vadd.f32 %v123_v45, %v118_v44  ;;  %v146_v56 = vmul.f32 %v243_v31, %v53_v15 }
  0x20   :  { %224 = vst [vmem:[%s384_s2 + $0x8] sm:$0xff] %v65_v48  ;;  %v151_v58 = vmul.f32 %v245_v36, %v58_v20  ;;  %v156_v59 = vmul.f32 %v247_v37, %v63_v23  ;;  %v164_v60 = vmul.f32 %v259_v46, %v26_v4  ;;  %v169_v61 = vmul.f32 %v260_v47, %v31_v5 }
  0x21   :  { %232 = vst [vmem:[%s384_s2 + $0x10] sm:$0xff] %v90_v53  ;;  %v111_v62 = vadd.f32 %v110_v41, %v106_v54  ;;  %v130_v63 = vadd.f32 %v129_v49, %v124_v55  ;;  %v147_v0 = vadd.f32 %v146_v56, %v142_v51  ;;  %v175_v1 = vmul.f32 %v262_v52, %v37_v8 }
  0x22   :  { %v170_v2 = vadd.f32 %v169_v61, %v164_v60  ;;  %v181_v3 = vmul.f32 %v264_v57, %v43_v9  ;;  %v188_v6 = vmul.f32 %v259_v46, %v49_v14  ;;  %v192_v7 = vmul.f32 %v260_v47, %v53_v15 }
  0x23   :  { %241 = vst [vmem:[%s384_s2 + $0x18] sm:$0xff] %v111_v62  ;;  %v136_v10 = vadd.f32 %v135_v50, %v130_v63  ;;  %v152_v11 = vadd.f32 %v151_v58, %v147_v0  ;;  %v197_v4 = vmul.f32 %v262_v52, %v58_v20  ;;  %v202_v13 = vmul.f32 %v264_v57, %v63_v23 }
  0x24   :  { %v176_v5 = vadd.f32 %v175_v1, %v170_v2  ;;  %v193_v12 = vadd.f32 %v192_v7, %v188_v6 }
  0x25   :  { %249 = vst [vmem:[%s384_s2 + $0x20] sm:$0xff] %v136_v10  ;;  %v157_v16 = vadd.f32 %v156_v59, %v152_v11 }
  0x26   :  { %v182_v8 = vadd.f32 %v181_v3, %v176_v5  ;;  %v198_v17 = vadd.f32 %v197_v4, %v193_v12 }
  0x27   :  { %258 = vst [vmem:[%s384_s2 + $0x28] sm:$0xff] %v157_v16 }
  0x28   :  { %266 = vst [vmem:[%s384_s2 + $0x30] sm:$0xff] %v182_v8  ;;  %v203_v9 = vadd.f32 %v202_v13, %v198_v17 }
  0x2a   :  { %275 = vst [vmem:[%s384_s2 + $0x38] sm:$0xff] %v203_v9 }
  0x2b   :  { %210 = vsyncpa [#allocation3], 1 }

</bundles_post_ra>
